<compile_context>
chip_gen: v5e
topology: v5e:2x2
jax: 0.10.0
libtpu: 0.0.40
codegen_flags: <defaults>
</compile_context>

<pallas_src>
import math

import jax
import jax.numpy as jnp
from jax.experimental import pallas as pl
from jax.experimental.pallas import tpu as pltpu


def _patch_embed_kernel(p_ref, w_ref, pos_ref, o_ref):
    # p_ref  : (TRg, g*PC)  grouped row-tile of flattened patches (cls rows = 0)
    # w_ref  : (g*PC, g*E)  block-diagonal projection weight (g copies of W^T)
    # pos_ref: (TRg, g*E)   fused additive term: bias + positions (+ cls on row 0)
    # o_ref  : (TRg, g*E)
    proj = jnp.dot(p_ref[...], w_ref[...], preferred_element_type=jnp.float32)
    o_ref[...] = (proj + pos_ref[...]).astype(o_ref.dtype)


def _round_up(a, m):
    return -(-a // m) * m


def _vmem_capacity_bytes():
    try:
        return int(pltpu.get_tpu_info().vmem_capacity_bytes)
    except Exception:  # off-TPU tracing / older runtimes: assume smallest (v7x per-TC)
        return 64 * 1024 * 1024


def _choose_tiling(b, rows, g, per_row_bytes, budget_bytes):
    """Pick (bt, b_pad): batch elements per grid step and zero-padded batch.

    Multi-step tiles must satisfy (bt*rows) % (8*g) == 0 so the grouped block's
    sublane count is 8-aligned; a single full-array block is always layout-legal.
    """
    bt_cap = max(1, budget_bytes // max(per_row_bytes * rows, 1))
    q = (8 * g) // math.gcd(rows, 8 * g)       # bt granularity for aligned tiles
    total_rows = b * rows
    # Split into >=2 grid steps when the work is big enough that each half still
    # amortises the ~0.35us/step overhead — lets v7x's two TensorCores share the
    # "parallel" axis; negligible cost on single-TC v5e/v6e.
    want_multi = total_rows >= 1024
    if not want_multi and b <= bt_cap:
        d = g // math.gcd(rows, g)             # ensure (b_pad*rows) % g == 0
        b_pad = _round_up(b, d)
        return b_pad, b_pad                    # grid == (1,), full-array blocks
    bt = max(q, (bt_cap // q) * q)
    if want_multi:
        bt = min(bt, max(q, _round_up(-(-b // 2), q)))   # >= 2 steps
    b_pad = _round_up(b, bt)
    return bt, b_pad


def patch_embedding_linear(x, weight, bias, cls_token, positions, patch_size):
    """Forward pass of PatchEmbedding_Linear.

    x:         (b, c, h, w)  NCHW, with w = num_patches_per_row * patch_size
    weight:    (emb_size, patch_size * c)   (torch nn.Linear layout)
    bias:      (emb_size,)
    cls_token: (1, 1, emb_size)
    positions: (num_patches + 1, emb_size)
    returns:   (b, num_patches + 1, emb_size)
    """
    b, c, h, w = x.shape
    assert w % patch_size == 0
    nw = w // patch_size
    n_patches = h * nw
    rows = n_patches + 1                         # +1 for the cls row
    emb = weight.shape[0]
    pc = patch_size * c
    dtype = x.dtype
    in_it = jnp.dtype(dtype).itemsize

    # Lane-density group: pack g consecutive output rows into one lane-dense
    # (g*emb)-wide stored row.  Implemented with wrapper reshapes + a
    # block-diagonal weight, so the kernel body is unchanged.
    if emb < 128 and 128 % emb == 0:
        g = min(8, 128 // emb)
    else:
        g = 1

    # VMEM byte budget -> batch tile bt and zero-padded batch b_pad.
    # Per ungrouped row: double-buffered input + output tiles, f32 matmul
    # intermediate, single-buffered f32 addend.
    per_row_bytes = 2 * pc * in_it + 2 * emb * in_it + 8 * emb
    vmem_cap = _vmem_capacity_bytes()
    bt, b_pad = _choose_tiling(b, rows, g, per_row_bytes, int(0.4 * vmem_cap))

    total_rows_pad = b_pad * rows
    grid = (b_pad // bt,)
    tr_g = (bt * rows) // g                      # grouped rows per tile

    # einops 'b c (h s1) (w s2) -> b (h w) (s1 s2 c)' (s1=1, s2=patch_size),
    # plus a prepended all-zero cls patch row per batch element and zero batch
    # padding.  All layout ops: under jit XLA fuses them into one copy of x.
    patches = x.reshape(b, c, h, nw, patch_size)
    patches = jnp.transpose(patches, (0, 2, 3, 4, 1)).reshape(b, n_patches, pc)
    patches = jnp.pad(patches, ((0, b_pad - b), (1, 0), (0, 0)))   # (b_pad, rows, pc)
    patches_g = patches.reshape(total_rows_pad // g, g * pc)       # lane-grouped slab

    # Projection weight, pre-transposed; replicated g times on a block diagonal
    # so one matmul emits g logical rows per lane-dense stored row
    # (0 @ anything = 0 keeps the zero cls rows exact).
    w_t = weight.T                                                  # (pc, emb)
    if g > 1:
        w_blk = jnp.einsum("gh,pe->gphe", jnp.eye(g, dtype=w_t.dtype), w_t)
        w_blk = w_blk.reshape(g * pc, g * emb)
    else:
        w_blk = w_t

    # Fused additive term (Linear bias + positions, cls+pos[0] on row 0), one
    # batch-tile worth in f32 for exact accumulation.  Constant index map +
    # Buffered(1): fetched once from HBM, single VMEM buffer.  Kept at tile
    # granularity (instead of (rows, emb) re-tiled in-kernel) to avoid an
    # in-VMEM relayout; its HBM cost is one tile, paid once per call.
    pos_fused = jnp.concatenate(
        [cls_token.reshape(1, emb) + positions[0:1, :],
         positions[1:, :] + bias[None, :]],
        axis=0).astype(jnp.float32)                                 # (rows, emb)
    pos_tile = jnp.tile(pos_fused, (bt, 1)).reshape(tr_g, g * emb)

    cost = pl.CostEstimate(
        flops=2 * (total_rows_pad // g) * (g * pc) * (g * emb),
        transcendentals=0,
        bytes_accessed=(patches_g.size * in_it
                        + w_blk.size * jnp.dtype(w_blk.dtype).itemsize
                        + pos_tile.size * 4
                        + (total_rows_pad // g) * (g * emb) * in_it),
    )

    out_g = pl.pallas_call(
        _patch_embed_kernel,
        out_shape=jax.ShapeDtypeStruct((total_rows_pad // g, g * emb), dtype),
        grid_spec=pl.GridSpec(
            grid=grid,
            in_specs=[
                pl.BlockSpec((tr_g, g * pc), lambda i: (i, 0)),
                pl.BlockSpec((g * pc, g * emb), lambda i: (0, 0),
                             pipeline_mode=pl.Buffered(1)),
                pl.BlockSpec((tr_g, g * emb), lambda i: (0, 0),
                             pipeline_mode=pl.Buffered(1)),
            ],
            out_specs=pl.BlockSpec((tr_g, g * emb), lambda i: (i, 0)),
        ),
        compiler_params=pltpu.CompilerParams(
            dimension_semantics=("parallel",),
            vmem_limit_bytes=int(0.75 * vmem_cap),
        ),
        cost_estimate=cost,
    )(patches_g, w_blk, pos_tile)

    # Ungroup rows (pure HBM reshape) and drop the padded batch elements.
    return out_g.reshape(b_pad, rows, emb)[:b]


def _reference(x, weight, bias, cls_token, positions, patch_size):
    b, c, h, w = x.shape
    nw = w // patch_size
    patches = x.reshape(b, c, h, nw, patch_size)
    patches = jnp.transpose(patches, (0, 2, 3, 4, 1)).reshape(b, h * nw, patch_size * c)
    y = patches @ weight.T + bias
    cls = jnp.broadcast_to(cls_token, (b, 1, weight.shape[0]))
    y = jnp.concatenate([cls, y], axis=1)
    return y + positions


if __name__ == "__main__":
    # Small shapes consistent with the module:
    #   in_channels=4, patch_size=2, seq_length=16, emb_size=32
    #   input x: (b=2, c=4, h=1, w=16)  ->  output (2, 16//2 + 1 = 9, 32)
    in_channels = 4
    patch_size = 2
    seq_length = 16
    emb_size = 32
    batch = 2

    key = jax.random.PRNGKey(0)
    kx, kw, kb, kc, kp = jax.random.split(key, 5)

    x = jax.random.normal(kx, (batch, in_channels, 1, seq_length), dtype=jnp.float32)
    weight = jax.random.normal(kw, (emb_size, patch_size * in_channels),
                               dtype=jnp.float32) * 0.1
    bias = jax.random.normal(kb, (emb_size,), dtype=jnp.float32) * 0.1
    cls_token = jax.random.normal(kc, (1, 1, emb_size), dtype=jnp.float32)
    positions = jax.random.normal(
        kp, (seq_length // patch_size + 1, emb_size), dtype=jnp.float32)

    fwd = jax.jit(patch_embedding_linear, static_argnames=("patch_size",))
    out = fwd(x, weight, bias, cls_token, positions, patch_size=patch_size)
    out = jax.block_until_ready(out)

    ref = _reference(x, weight, bias, cls_token, positions, patch_size)
    assert out.shape == (batch, seq_length // patch_size + 1, emb_size)
    assert jnp.allclose(out, ref, atol=1e-5, rtol=1e-5)

    print("KERNEL_OK")
</pallas_src>

<mosaic_0001>
module attributes {stable_mosaic.version = 11 : i64} {
  func.func @_patch_embed_kernel(%arg0: i32, %arg1: memref<9x32xf32, #tpu.memory_space<vmem>>, %arg2: memref<32x128xf32, #tpu.memory_space<vmem>>, %arg3: memref<9x128xf32, #tpu.memory_space<vmem>>, %arg4: memref<9x128xf32, #tpu.memory_space<vmem>>) attributes {dimension_semantics = [#tpu.dimension_semantics<parallel>], iteration_bounds = array<i64: 1>, scalar_prefetch = 0 : i64, scratch_operands = 0 : i64, tpu.core_type = #tpu.core_type<tc>, window_params = [{transform_indices = @transform_0, window_bounds = array<i64: 9, 32>}, {pipeline_mode = #tpu.pipeline_mode<synchronous>, transform_indices = @transform_1, window_bounds = array<i64: 32, 128>}, {pipeline_mode = #tpu.pipeline_mode<synchronous>, transform_indices = @transform_2, window_bounds = array<i64: 9, 128>}, {transform_indices = @transform_3, window_bounds = array<i64: 9, 128>}]} {
    %c0 = arith.constant 0 : index
    %c0_0 = arith.constant 0 : index
    %0 = vector.load %arg1[%c0, %c0_0] : memref<9x32xf32, #tpu.memory_space<vmem>>, vector<9x32xf32>
    %c0_1 = arith.constant 0 : index
    %c0_2 = arith.constant 0 : index
    %1 = vector.load %arg2[%c0_1, %c0_2] : memref<32x128xf32, #tpu.memory_space<vmem>>, vector<32x128xf32>
    %cst = arith.constant dense<0.000000e+00> : vector<9x128xf32>
    %2 = tpu.matmul %0, %1, %cst {dimension_numbers = #tpu.dot_dimension_numbers<[1], [0], [0], [1], [0, 0, 1, 1], [], []>} : vector<9x32xf32>, vector<32x128xf32>, vector<9x128xf32> -> vector<9x128xf32>
    %c0_3 = arith.constant 0 : index
    %c0_4 = arith.constant 0 : index
    %3 = vector.load %arg3[%c0_3, %c0_4] : memref<9x128xf32, #tpu.memory_space<vmem>>, vector<9x128xf32>
    %4 = arith.addf %2, %3 : vector<9x128xf32>
    %c0_5 = arith.constant 0 : index
    %c0_6 = arith.constant 0 : index
    %5 = vector.load %arg4[%c0_5, %c0_6] : memref<9x128xf32, #tpu.memory_space<vmem>>, vector<9x128xf32>
    tpu.vector_store %arg4[%c0_5, %c0_6], %4 {strides = array<i32>} : memref<9x128xf32, #tpu.memory_space<vmem>>, vector<9x128xf32>,
    return
  }
  func.func @transform_0(%arg0: i32) -> (i32, i32) {
    %c0_i32 = arith.constant 0 : i32
    %c0_i32_0 = arith.constant 0 : i32
    return %arg0, %c0_i32 : i32, i32
  }
  func.func @transform_1(%arg0: i32) -> (i32, i32) {
    %c0_i32 = arith.constant 0 : i32
    %c0_i32_0 = arith.constant 0 : i32
    %c0_i32_1 = arith.constant 0 : i32
    return %c0_i32, %c0_i32_0 : i32, i32
  }
  func.func @transform_2(%arg0: i32) -> (i32, i32) {
    %c0_i32 = arith.constant 0 : i32
    %c0_i32_0 = arith.constant 0 : i32
    %c0_i32_1 = arith.constant 0 : i32
    return %c0_i32, %c0_i32_0 : i32, i32
  }
  func.func @transform_3(%arg0: i32) -> (i32, i32) {
    %c0_i32 = arith.constant 0 : i32
    %c0_i32_0 = arith.constant 0 : i32
    return %arg0, %c0_i32 : i32, i32
  }
}

</mosaic_0001>

<bundles_post_ra>
// kernel: tile.8
= control target key start
LH: loop header
LB: loop body
LE: loop exit
PB: predicated region body
PF: predicated region fallthrough
CT: control target
= control target key end

     0   :  { %s70_s0 = inlined_call_operand.vmem [shape: f32[9,32], index: 0, kind: input, shape index: {}]   ;;  %s71_s1 = inlined_call_operand.vmem [shape: f32[4,9,1,32], index: 1, kind: output, shape index: {}]  }
   0x1   :  { %v4_v0 = vld [vmem:[%s70_s0] sm:$0xff]  ;;  %v25_v1 = vld [vmem:[%s70_s0 + $0x8] sm:$0xff] }
   0x2   :  { %5 = vst [vmem:[%s71_s1] sm:$0xff] %v4_v0 }
   0x3   :  { %22 = vst [vmem:[%s71_s1 + $0x10] sm:$0xff] %v4_v0 }
   0x4   :  { %23 = vst [vmem:[%s71_s1 + $0x20] sm:$0xff] %v4_v0 }
   0x5   :  { %24 = vst [vmem:[%s71_s1 + $0x30] sm:$0xff] %v4_v0 }
   0x6   :  { %26 = vst [vmem:[%s71_s1 + $0x8] sm:$0xff] %v25_v1 }
   0x7   :  { %27 = vst [vmem:[%s71_s1 + $0x18] sm:$0xff] %v25_v1 }
   0x8   :  { %28 = vst [vmem:[%s71_s1 + $0x28] sm:$0xff] %v25_v1 }
   0x9   :  { %29 = vst [vmem:[%s71_s1 + $0x38] sm:$0xff] %v25_v1 }

// kernel: tile.9
= control target key start
LH: loop header
LB: loop body
LE: loop exit
PB: predicated region body
PF: predicated region fallthrough
CT: control target
= control target key end

     0   :  { %vm27_vm0 = vcmask 1045507   ;;  %s30_s6 = smov 192  ;;  %vm32_vm1 = vcmask 1047558   ;;  %s52_s15 = smov 192  ;;  %vm3_vm2 = vcmask 261120   ;;  %vm36_vm3 = vcmask 1048320   ;;  %s210_s0 = inlined_call_operand.vmem [shape: f32[4,9,1,32], index: 0, kind: input, shape index: {}]   ;;  %s211_s1 = inlined_call_operand.vmem [shape: f32[9,128], index: 1, kind: output, shape index: {}]  }
   0x1   :  { %v95_v0 = vld.sshfl [vmem:[%s210_s0 + $0x3] sm:$0xff pattern:$0xffffff40]   ;;  %v96_v1 = vld.sshfl [vmem:[%s210_s0 + $0x16] sm:$0xff pattern:$0xfffb0000]  }
   0x2   :  { %v28_v2 = vsel %vm27_vm0, %v96_v1, %v95_v0  ;;  %v97_v3 = vld [vmem:[%s210_s0 + $0x18] ss:$4 sm:%s30_s6]   ;;  %v100_v4 = vld.sshfl [vmem:[%s210_s0 + $0x2] sm:$0xff pattern:$0xffffff40]   ;;  %s113_s20 = smov 96  }
   0x3   :  { %v33_v5 = vsel %vm32_vm1, %v97_v3, %v28_v2  ;;  %v101_v6 = vld.sshfl [vmem:[%s210_s0 + $0x15] sm:$0xff pattern:$0xfffb0000]   ;;  %v102_v7 = vld [vmem:[%s210_s0 - $0x1a] ss:$11 sm:%s52_s15]   ;;  %s74_s21 = smov 192 }
   0x4   :  { %34 = vrot.lane.b32.xlu0 %v33_v5, %s113_s20  ;;  %v50_v8 = vsel %vm27_vm0, %v101_v6, %v100_v4  ;;  %v105_v10 = vld.sshfl [vmem:[%s210_s0 + $0x1] sm:$0xff pattern:$0xffffff40]   ;;  %v106_v11 = vld.sshfl [vmem:[%s210_s0 + $0x14] sm:$0xff pattern:$0xfff40000]  }
   0x5   :  { %v55_v9 = vsel %vm32_vm1, %v102_v7, %v50_v8  ;;  %s114_s26 = smov 64   ;;  %v72_v12 = vsel %vm27_vm0, %v106_v11, %v105_v10  ;;  %v107_v13 = vld [vmem:[%s210_s0 - $0x1b] ss:$11 sm:%s74_s21]   ;;  %s115_s29 = smov 32   ;;  %v98_v15 = vld [vmem:[%s210_s0 + $0x38] sm:$0x1]  }
   0x6   :  { %56 = vrot.lane.b32.xlu1 %v55_v9, %s114_s26  ;;  %v77_v14 = vsel %vm32_vm1, %v107_v13, %v72_v12  ;;  %v103_v16 = vld [vmem:[%s210_s0 + $0x37] sm:$0x1]   ;;  %v108_v17 = vld [vmem:[%s210_s0 + $0x36] sm:$0x1]   ;;  %s6_s7 = smov 3  ;;  %s12_s8 = smov 3 }
   0x7   :  { %78 = vrot.lane.b32.xlu2 %v77_v14, %s115_s29  ;;  %s18_s9 = smov 3  ;;  %v2_v18 = vld [vmem:[%s210_s0] ss:$4 sm:$0x7]   ;;  %v89_v19 = vld [vmem:[%s210_s0 + $0x13] ss:$4 sm:%s6_s7]  }
   0x8   :  { %4 = vst.msk [vmem:[%s211_s1] sm:$0x7] %vm3_vm2, %v2_v18   ;;  %v91_v20 = vld [vmem:[%s210_s0 + $0x22] ss:$4 sm:%s12_s8]   ;;  %vm58_vm4 = vcmask 785920   ;;  %vm80_vm5 = vcmask 523520  }
   0x9   :  { %90 = vst.msk [vmem:[%s211_s1 + $0x3] sm:$0x3] %vm3_vm2, %v89_v19   ;;  %v93_v21 = vld [vmem:[%s210_s0 + $0x31] ss:$4 sm:%s18_s9]  }
   0xa   :  { %92 = vst.msk [vmem:[%s211_s1 + $0x5] sm:$0x3] %vm3_vm2, %v91_v20  }
   0xb   :  { %94 = vst.msk [vmem:[%s211_s1 + $0x7] sm:$0x3] %vm3_vm2, %v93_v21  }
   0xc   :  { %40 = vrot.lane.b32.xlu0 %v98_v15, %s113_s20 }
   0xe   :  { %62 = vrot.lane.b32.xlu1 %v103_v16, %s114_s26 }
   0xf   :  { %84 = vrot.lane.b32.xlu2 %v108_v17, %s115_s29 }
  0x61   :  { %v79_v22 = vpop.permute.xlu2 %78  }
  0x69   :  { %v85_v23 = vpop.permute.xlu2 %84  }
  0x76   :  { %v35_v24 = vpop.permute.xlu0 %34  }
  0x77   :  { %37 = vst.msk [vmem:[%s211_s1] sm:$0xff] %vm36_vm3, %v35_v24  }
  0x78   :  { %v57_v25 = vpop.permute.xlu1 %56  }
  0x79   :  { %59 = vst.msk [vmem:[%s211_s1] sm:$0xff] %vm58_vm4, %v57_v25  }
  0x7a   :  { %81 = vst.msk [vmem:[%s211_s1] sm:$0xff] %vm80_vm5, %v79_v22  }
  0x7e   :  { %v41_v26 = vpop.permute.xlu0 %40  }
  0x7f   :  { %99 = vst.msk [vmem:[%s211_s1 + $0x8] sm:$0x1] %vm36_vm3, %v41_v26  }
  0x80   :  { %v63_v27 = vpop.permute.xlu1 %62  }
  0x81   :  { %104 = vst.msk [vmem:[%s211_s1 + $0x8] sm:$0x1] %vm58_vm4, %v63_v27  }
  0x82   :  { %109 = vst.msk [vmem:[%s211_s1 + $0x8] sm:$0x1] %vm80_vm5, %v85_v23  }

// kernel: patch_embedding_linear.1
= control target key start
LH: loop header
LB: loop body
LE: loop exit
PB: predicated region body
PF: predicated region fallthrough
CT: control target
= control target key end

     0   :  { %vm22_vm0 = vcmask 261120   ;;  %s114_s1 = inlined_call_operand.vmem [shape: f32[32,128], index: 1, kind: input, shape index: {}]   ;;  %s115_s0 = inlined_call_operand.vmem [shape: f32[9,32], index: 0, kind: input, shape index: {}]   ;;  %s116_s2 = inlined_call_operand.vmem [shape: f32[9,128], index: 2, kind: input, shape index: {}]   ;;  %s117_s3 = inlined_call_operand.vmem [shape: f32[9,128], index: 3, kind: output, shape index: {}]  }
   0x1   :  { %v19_v0 = vld [vmem:[%s114_s1 + $0x18] sm:$0xff]  ;;  %v18_v1 = vld [vmem:[%s114_s1 + $0x10] sm:$0xff]  ;;  %v17_v2 = vld [vmem:[%s114_s1 + $0x8] sm:$0xff] }
   0x2   :  { %41 = vmatpush.msra.mxu0 %v19_v0  ;;  %60 = vmatpush.msra.mxu1 %v19_v0  ;;  %v16_v3 = vld [vmem:[%s114_s1] sm:$0xff]  ;;  %v15_v5 = vld [vmem:[%s115_s0 + $0x8] sm:$0x1] }
   0x3   :  { %v14_v4 = vld [vmem:[%s115_s0] sm:$0xff]  ;;  %v21_v7 = vld [vmem:[%s116_s2 + $0x8] sm:$0x1] }
   0x4   :  { %42 = vmatpush.msra.mxu0 %v18_v1  ;;  %61 = vmatpush.msra.mxu1 %v18_v1  ;;  %v20_v6 = vld [vmem:[%s116_s2] sm:$0xff] }
   0x6   :  { %43 = vmatpush.msra.mxu0 %v17_v2  ;;  %62 = vmatpush.msra.mxu1 %v17_v2 }
   0x8   :  { %44 = vmatpush.msra.mxu0 %v16_v3  ;;  %63 = vmatpush.msra.mxu1 %v16_v3 }
   0x9   :  { %58 = vmatmul.msk.f32.vlgmr.msra.gmra.mxu0 %vm22_vm0, %v14_v4  ;;  %59 = vmatmul.msk.f32.vlgmr.msra.gmra.mxu1 %vm22_vm0, %v15_v5 }
  0x86   :  { %v46_v8 = vpop.f32.mrf.mxu0  ;;  %v49_v9 = vpop.f32.mrf.mxu1 }
  0x87   :  { %v47_v10 = vadd.f32 %v46_v8, %v20_v6  ;;  %v50_v11 = vadd.f32 %v49_v9, %v21_v7 }
  0x89   :  { %52 = vst [vmem:[%s117_s3] sm:$0xff] %v47_v10 }
  0x8a   :  { %53 = vst [vmem:[%s117_s3 + $0x8] sm:$0x1] %v50_v11 }

</bundles_post_ra>
